<compile_context>
chip_gen: v7x
topology: tpu7x:2x2x1
jax: 0.10.0
libtpu: 0.0.40
codegen_flags: <defaults>
</compile_context>

<pallas_src>
import functools

import jax
import jax.numpy as jnp
from jax import lax
from jax.experimental import pallas as pl
from jax.experimental.pallas import tpu as pltpu


# ----------------------------------------------------------------------------
# Pallas kernel: 3x3 conv, stride 1, NCHW activation, pad folded in-kernel.
# ----------------------------------------------------------------------------
def _conv3x3_kernel(x_hbm, w_ref, b_ref, col_ref, o_ref, xbuf, sems, *,
                    tile_h, width, n_h, has_relu, fuse_dx, cross_prefetch,
                    x_dtype):
    # x_hbm  : (N, Cin, H*W)        raw HBM ref (manual halo DMA)
    # w_ref  : (3, Cout, 3*Cin)     fused weight; [dx, co, dy*Cin + ci]
    # b_ref  : (Cout, 1)            fused bias (f32)
    # col_ref: (1, M)               output-column index per lane (int32)
    # o_ref  : (1, Cout, M)         lane-dense NCHW-flat output tile
    # xbuf   : (2, Cin, L)          VMEM double buffer of flat halo windows
    # sems   : (2, 3) DMA sems      [slot][main, top-halo, bottom-halo]
    n = pl.program_id(0)
    h = pl.program_id(1)
    num_n = pl.num_programs(0)

    cin = xbuf.shape[1]
    cout = o_ref.shape[1]
    M = tile_h * width
    # Extra left padding so the main DMA destination starts 128-lane aligned.
    lane_pad = (-(1 + width)) % 128

    step = n * n_h + h
    slot = step % 2

    def start_copies(n_idx, h_idx, slot_idx):
        r0 = h_idx * M
        if M % 128 == 0:
            r0 = pl.multiple_of(r0, 128)
        # Main rows of the tile (contiguous per channel in NCHW).
        pltpu.make_async_copy(
            x_hbm.at[n_idx, :, pl.ds(r0, M)],
            xbuf.at[slot_idx, :, pl.ds(lane_pad + 1 + width, M)],
            sems.at[slot_idx, 0]).start()
        if n_h > 1:
            @pl.when(h_idx > 0)
            def _():
                pltpu.make_async_copy(
                    x_hbm.at[n_idx, :, pl.ds(r0 - width, width)],
                    xbuf.at[slot_idx, :, pl.ds(lane_pad + 1, width)],
                    sems.at[slot_idx, 1]).start()

            @pl.when(h_idx < n_h - 1)
            def _():
                pltpu.make_async_copy(
                    x_hbm.at[n_idx, :, pl.ds(r0 + M, width)],
                    xbuf.at[slot_idx, :, pl.ds(lane_pad + 1 + width + M, width)],
                    sems.at[slot_idx, 2]).start()

    def wait_copies(h_idx, slot_idx):
        pltpu.make_async_copy(
            x_hbm.at[0, :, pl.ds(0, M)],
            xbuf.at[slot_idx, :, pl.ds(lane_pad + 1 + width, M)],
            sems.at[slot_idx, 0]).wait()
        if n_h > 1:
            @pl.when(h_idx > 0)
            def _():
                pltpu.make_async_copy(
                    x_hbm.at[0, :, pl.ds(0, width)],
                    xbuf.at[slot_idx, :, pl.ds(lane_pad + 1, width)],
                    sems.at[slot_idx, 1]).wait()

            @pl.when(h_idx < n_h - 1)
            def _():
                pltpu.make_async_copy(
                    x_hbm.at[0, :, pl.ds(0, width)],
                    xbuf.at[slot_idx, :, pl.ds(lane_pad + 1 + width + M, width)],
                    sems.at[slot_idx, 2]).wait()

    # ---- prologue: prime the pipeline -------------------------------------
    if cross_prefetch:
        is_first = jnp.logical_and(n == 0, h == 0)
    else:
        # batch-parallel (megacore) mode: every image re-primes at h == 0.
        is_first = h == 0

    @pl.when(is_first)
    def _():
        start_copies(n, h, slot)

    wait_copies(h, slot)

    # ---- prefetch the next halo window (incl. across images) --------------
    if cross_prefetch:
        next_in_img = h + 1 < n_h
        have_next = jnp.logical_or(next_in_img, n + 1 < num_n)
        nn = jnp.where(next_in_img, n, n + 1)
        nh = jnp.where(next_in_img, h + 1, 0)
    else:
        have_next = h + 1 < n_h
        nn = n
        nh = h + 1

    @pl.when(have_next)
    def _():
        start_copies(nn, nh, 1 - slot)

    # ---- fold the vertical zero padding into VMEM -------------------------
    zrow = jnp.zeros((cin, width), dtype=x_dtype)

    @pl.when(h == 0)
    def _():
        xbuf[slot, :, pl.ds(lane_pad + 1, width)] = zrow

    @pl.when(h == n_h - 1)
    def _():
        xbuf[slot, :, pl.ds(lane_pad + 1 + width + M, width)] = zrow

    # ---- compute: (Cout, M) = sum_taps W_tap @ X_tap ----------------------
    # The horizontal (left/right) zero padding is realized by masking the two
    # wrapped lanes (x == 0 for dx == 0 taps, x == W-1 for dx == 2 taps).
    col = col_ref[...]                       # (1, M) int32
    keep_l = col != 0
    keep_r = col != (width - 1)

    acc = jnp.zeros((cout, M), jnp.float32)
    for dx in range(3):
        if fuse_dx:
            # Sublane-aligned concat (Cin % 8 == 0): one dot with K = 3*Cin.
            pieces = [xbuf[slot, :, pl.ds(lane_pad + dy * width + dx, M)]
                      for dy in range(3)]
            xg = jnp.concatenate(pieces, axis=0)         # (3*Cin, M)
            if dx == 0:
                xg = jnp.where(keep_l, xg, jnp.zeros_like(xg))
            elif dx == 2:
                xg = jnp.where(keep_r, xg, jnp.zeros_like(xg))
            acc = acc + lax.dot_general(
                w_ref[dx], xg,
                dimension_numbers=(((1,), (0,)), ((), ())),
                preferred_element_type=jnp.float32)
        else:
            # Small / unaligned Cin: 9 per-tap dots, no misaligned concat.
            wg = w_ref[dx]                               # (Cout, 3*Cin)
            for dy in range(3):
                xt = xbuf[slot, :, pl.ds(lane_pad + dy * width + dx, M)]
                if dx == 0:
                    xt = jnp.where(keep_l, xt, jnp.zeros_like(xt))
                elif dx == 2:
                    xt = jnp.where(keep_r, xt, jnp.zeros_like(xt))
                wt = wg[:, dy * cin:(dy + 1) * cin]      # (Cout, Cin)
                acc = acc + lax.dot_general(
                    wt, xt,
                    dimension_numbers=(((1,), (0,)), ((), ())),
                    preferred_element_type=jnp.float32)

    acc = acc + b_ref[...]                               # (Cout, 1) broadcast
    if has_relu:
        acc = jnp.where(acc >= 0, acc, acc * jnp.float32(0.05))

    # Lane-dense, NCHW-flat store; wrapper reshape back to NCHW is free.
    o_ref[0] = acc.astype(o_ref.dtype)


def conv3x3_pallas(x_flat, w_groups, bias, col_ids, H, W, tile_h, has_relu,
                   fuse_dx, batch_parallel, out_dtype, vmem_limit_bytes):
    N, Cin, HW = x_flat.shape
    _, Cout, K3 = w_groups.shape
    assert HW == H * W and K3 == 3 * Cin
    assert H % tile_h == 0
    M = tile_h * W
    assert M % 128 == 0 or tile_h == H, (
        "tile_h * W must be a multiple of 128 unless one tile spans all rows")
    n_h = H // tile_h
    lane_pad = (-(1 + W)) % 128
    L = lane_pad + (tile_h + 2) * W + 2

    cross_prefetch = not batch_parallel
    kernel = functools.partial(
        _conv3x3_kernel, tile_h=tile_h, width=W, n_h=n_h, has_relu=has_relu,
        fuse_dx=fuse_dx, cross_prefetch=cross_prefetch, x_dtype=x_flat.dtype)

    in_bytes = jnp.dtype(x_flat.dtype).itemsize
    out_bytes = jnp.dtype(out_dtype).itemsize
    cost = pl.CostEstimate(
        flops=2 * N * H * W * Cout * 9 * Cin,
        transcendentals=0,
        bytes_accessed=(N * Cin * H * W * in_bytes
                        + 3 * Cout * K3 * in_bytes + Cout * 4
                        + N * Cout * H * W * out_bytes))

    grid_spec = pltpu.PrefetchScalarGridSpec(
        num_scalar_prefetch=0,
        grid=(N, n_h),
        in_specs=[
            pl.BlockSpec(memory_space=pl.ANY),                  # x stays in HBM
            pl.BlockSpec((3, Cout, K3), lambda n, h: (0, 0, 0)),  # resident weight
            pl.BlockSpec((Cout, 1), lambda n, h: (0, 0)),         # resident bias
            pl.BlockSpec((1, M), lambda n, h: (0, 0)),            # column ids
        ],
        out_specs=pl.BlockSpec((1, Cout, M), lambda n, h: (n, 0, h)),
        scratch_shapes=[
            pltpu.VMEM((2, Cin, L), x_flat.dtype),
            pltpu.SemaphoreType.DMA((2, 3)),
        ])

    return pl.pallas_call(
        kernel,
        out_shape=jax.ShapeDtypeStruct((N, Cout, H * W), out_dtype),
        grid_spec=grid_spec,
        compiler_params=pltpu.CompilerParams(
            # batch_parallel=True: shard images across the 2 TCs (v7x); the
            # row-tile axis stays "arbitrary" since it carries the manual
            # double-buffered halo DMA chain.
            # batch_parallel=False (default): both axes arbitrary, which lets
            # the last tile of image n prefetch the first tile of image n+1.
            dimension_semantics=(("parallel" if batch_parallel else "arbitrary"),
                                 "arbitrary"),
            vmem_limit_bytes=int(vmem_limit_bytes)),
        cost_estimate=cost,
    )(x_flat, w_groups, bias, col_ids)


# ----------------------------------------------------------------------------
# Parameter fusion (equivalent of Conv3XC2.update_params, groups=1 path).
# ----------------------------------------------------------------------------
def fuse_conv3xc2_params(w1, b1, w2, b2, w3, b3, sk_w, sk_b):
    HI = lax.Precision.HIGHEST
    W1 = w1[:, :, 0, 0]            # (c_in*g, c_in)
    W3 = w3[:, :, 0, 0]            # (c_out, c_out*g)
    w_eff = jnp.einsum('om,mcyx,ci->oiyx', W3, w2, W1, precision=HI)
    b_mid = jnp.einsum('mcyx,c->m', w2, b1, precision=HI) + b2
    b_eff = jnp.einsum('om,m->o', W3, b_mid, precision=HI) + b3
    # Skip 1x1 conv folds into the center tap of the fused 3x3 kernel.
    w_eff = w_eff.at[:, :, 1, 1].add(sk_w[:, :, 0, 0])
    b_eff = b_eff + sk_b
    return w_eff, b_eff


# ----------------------------------------------------------------------------
# Generation-aware VMEM budgeting and tile selection ((8,128)-padded sizes).
# ----------------------------------------------------------------------------
def _vmem_limits():
    try:
        cap = int(pltpu.get_tpu_info().vmem_capacity_bytes)
    except Exception:
        cap = 64 << 20                      # conservative (v7x per-TC size)
    # v7x (64 MiB): budget ~32 MiB, limit ~48 MiB; v5e/v6e (128 MiB): ~64/96.
    budget = min(cap // 2, 64 << 20)
    limit = max(min(int(cap * 0.75), 100 << 20), 32 << 20)
    return budget, limit


def _pick_tile_h(H, W, cin, cout, in_item, out_item, fuse_dx, budget_bytes):
    def ru(v, m):
        return ((v + m - 1) // m) * m

    def footprint(th):
        m = th * W
        lane_pad = (-(1 + W)) % 128
        l = lane_pad + (th + 2) * W + 2
        xbuf = 2 * ru(cin, 8) * ru(l, 128) * in_item        # manual double buffer
        outblk = 2 * ru(cout, 8) * ru(m, 128) * out_item    # pallas double buffer
        wblk = 2 * 3 * ru(cout, 8) * ru(3 * cin, 128) * in_item
        acc = ru(cout, 8) * ru(m, 128) * 4
        kdim = 3 * cin if fuse_dx else cin
        xcol = 2 * ru(kdim, 8) * ru(m, 128) * in_item       # im2col temporary
        misc = 8 * ru(m, 128) * 4 + (2 << 20)               # masks + headroom
        return xbuf + outblk + wblk + acc + xcol + misc

    cands = [t for t in range(1, H + 1)
             if H % t == 0 and ((t * W) % 128 == 0 or t == H)]
    fitting = [t for t in cands if footprint(t) <= budget_bytes]
    if fitting:
        return max(fitting)
    return min(cands)   # smallest legal tile; cands always contains H


# ----------------------------------------------------------------------------
# Conv3XC2 forward (eval mode), NCHW in / NCHW out.
# ----------------------------------------------------------------------------
def conv3xc2_forward(x_nchw, params, stride=1, has_relu=False, tile_h=None,
                     batch_parallel=False, vmem_budget_bytes=None,
                     vmem_limit_bytes=None):
    # TODO(synk): stride > 1 / groups > 1 not implemented (module defaults).
    assert stride == 1, "only stride=1 supported"
    w_eff, b_eff = fuse_conv3xc2_params(*params)            # OIHW, (Cout,)
    Cout, Cin = w_eff.shape[0], w_eff.shape[1]
    N, xcin, H, W = x_nchw.shape
    assert xcin == Cin

    cdt = x_nchw.dtype
    # (Cout, Cin, 3, 3) -> (dx, Cout, dy*Cin + ci): matches in-kernel K order.
    w_groups = jnp.transpose(w_eff, (3, 0, 2, 1)).reshape(3, Cout, 3 * Cin)
    w_groups = w_groups.astype(cdt)
    bias = b_eff.reshape(Cout, 1).astype(jnp.float32)

    fuse_dx = (Cin % 8 == 0)

    auto_budget, auto_limit = _vmem_limits()
    budget = auto_budget if vmem_budget_bytes is None else vmem_budget_bytes
    limit = auto_limit if vmem_limit_bytes is None else vmem_limit_bytes

    in_item = jnp.dtype(cdt).itemsize
    if tile_h is None:
        tile_h = _pick_tile_h(H, W, Cin, Cout, in_item, in_item, fuse_dx, budget)
    assert H % tile_h == 0, "tile_h must divide H (TODO(synk): remainder tile)"

    # Free reshapes: NCHW -> NC(HW) on input, NC(HW) -> NCHW on output.
    x_flat = x_nchw.reshape(N, Cin, H * W)
    M = tile_h * W
    col_ids = jnp.tile(jnp.arange(W, dtype=jnp.int32), tile_h).reshape(1, M)

    out_flat = conv3x3_pallas(x_flat, w_groups, bias, col_ids, H, W, tile_h,
                              has_relu, fuse_dx, batch_parallel, cdt, limit)
    return out_flat.reshape(N, Cout, H, W)


# ----------------------------------------------------------------------------
# Reference (unfused training-path math == eval-path fused conv) + init.
# ----------------------------------------------------------------------------
def reference_forward(x, params, has_relu):
    w1, b1, w2, b2, w3, b3, sk_w, sk_b = params
    dn = ("NCHW", "OIHW", "NCHW")
    conv = lambda a, w: lax.conv_general_dilated(
        a, w, window_strides=(1, 1), padding="VALID", dimension_numbers=dn,
        precision=lax.Precision.HIGHEST)
    xpad = jnp.pad(x, ((0, 0), (0, 0), (1, 1), (1, 1)))
    u = conv(xpad, w1) + b1[None, :, None, None]
    v = conv(u, w2) + b2[None, :, None, None]
    y = conv(v, w3) + b3[None, :, None, None]
    sk = conv(x, sk_w) + sk_b[None, :, None, None]
    out = y + sk
    if has_relu:
        out = jnp.where(out >= 0, out, 0.05 * out)
    return out


def make_params(key, c_in, c_out, gain=1):
    ks = jax.random.split(key, 8)
    f = lambda k, shape: (0.1 * jax.random.normal(k, shape)).astype(jnp.float32)
    w1 = f(ks[0], (c_in * gain, c_in, 1, 1))
    b1 = f(ks[1], (c_in * gain,))
    w2 = f(ks[2], (c_out * gain, c_in * gain, 3, 3))
    b2 = f(ks[3], (c_out * gain,))
    w3 = f(ks[4], (c_out, c_out * gain, 1, 1))
    b3 = f(ks[5], (c_out,))
    sk_w = f(ks[6], (c_out, c_in, 1, 1))
    sk_b = f(ks[7], (c_out,))
    return (w1, b1, w2, b2, w3, b3, sk_w, sk_b)


if __name__ == "__main__":
    key = jax.random.PRNGKey(0)
    k_x, k_p, k_p2 = jax.random.split(key, 3)

    N, C_IN, C_OUT, H, W = 2, 4, 8, 16, 16
    x = jax.random.normal(k_x, (N, C_IN, H, W), dtype=jnp.float32)
    params = make_params(k_p, C_IN, C_OUT, gain=1)

    ref = reference_forward(x, params, has_relu=False)
    ref_relu = reference_forward(x, params, has_relu=True)

    # 1) f32, auto tile (single row-tile per image), per-tap MXU path (Cin=4).
    out = jax.block_until_ready(conv3xc2_forward(x, params, has_relu=False))
    assert out.shape == (N, C_OUT, H, W)
    assert jnp.allclose(out, ref, atol=1e-3, rtol=1e-3), "case 1 failed"

    # 2) explicit 2-tile halo pipeline (cross-image prefetch) + leaky relu.
    out2 = jax.block_until_ready(
        conv3xc2_forward(x, params, has_relu=True, tile_h=8))
    assert jnp.allclose(out2, ref_relu, atol=1e-3, rtol=1e-3), "case 2 failed"

    # 3) megacore batch-parallel variant (per-image DMA priming, no
    #    cross-image prefetch) - the v7x N>1 configuration.
    out3 = jax.block_until_ready(
        conv3xc2_forward(x, params, has_relu=False, tile_h=8,
                         batch_parallel=True))
    assert jnp.allclose(out3, ref, atol=1e-3, rtol=1e-3), "case 3 failed"

    # 4) Cin % 8 == 0 -> sublane-aligned dx-grouped dots (K = 3*Cin).
    x8 = jax.random.normal(k_x, (N, 8, H, W), dtype=jnp.float32)
    params8 = make_params(k_p2, 8, C_OUT, gain=1)
    ref8 = reference_forward(x8, params8, has_relu=False)
    out4 = jax.block_until_ready(
        conv3xc2_forward(x8, params8, has_relu=False, tile_h=8))
    assert jnp.allclose(out4, ref8, atol=1e-3, rtol=1e-3), "case 4 failed"

    # 5) bf16 activations (as an upstream bf16 pipeline would provide),
    #    f32 accumulation, looser tolerance.
    out5 = jax.block_until_ready(
        conv3xc2_forward(x.astype(jnp.bfloat16), params, has_relu=False,
                         tile_h=8))
    assert jnp.allclose(out5.astype(jnp.float32), ref, atol=5e-2, rtol=5e-2), \
        "case 5 failed"

    print("KERNEL_OK")
</pallas_src>

<mosaic_0001>
module attributes {stable_mosaic.version = 11 : i64} {
  func.func @_conv3x3_kernel(%arg0: i32, %arg1: i32, %arg2: memref<2x4x256xf32, #tpu.memory_space<any>>, %arg3: memref<3x8x12xf32, #tpu.memory_space<vmem>>, %arg4: memref<8x1xf32, #tpu.memory_space<vmem>>, %arg5: memref<1x256xi32, #tpu.memory_space<vmem>>, %arg6: memref<1x8x256xf32, #tpu.memory_space<vmem>>, %arg7: memref<2x4x401xf32, #tpu.memory_space<vmem>>, %arg8: memref<2x3x!tpu.dma_semaphore, #tpu.memory_space<semaphore_mem>>) attributes {dimension_semantics = [#tpu.dimension_semantics<arbitrary>, #tpu.dimension_semantics<arbitrary>], iteration_bounds = array<i64: 2, 1>, scalar_prefetch = 0 : i64, scratch_operands = 2 : i64, tpu.core_type = #tpu.core_type<tc>, window_params = [{}, {pipeline_mode = #tpu.pipeline_mode<synchronous>, transform_indices = @transform_1, window_bounds = array<i64: 3, 8, 12>}, {pipeline_mode = #tpu.pipeline_mode<synchronous>, transform_indices = @transform_2, window_bounds = array<i64: 8, 1>}, {pipeline_mode = #tpu.pipeline_mode<synchronous>, transform_indices = @transform_3, window_bounds = array<i64: 1, 256>}, {transform_indices = @transform_4, window_bounds = array<i64: 1, 8, 256>}]} {
    %c1_i32 = arith.constant 1 : i32
    %0 = arith.muli %arg0, %c1_i32 : i32
    %1 = arith.addi %0, %arg1 : i32
    %c2_i32 = arith.constant 2 : i32
    %c0_i32 = arith.constant 0 : i32
    %2 = arith.cmpi eq, %c2_i32, %c0_i32 : i32
    %c1_i32_0 = arith.constant 1 : i32
    %3 = arith.select %2, %c1_i32_0, %c2_i32 : i32
    %4 = arith.remsi %1, %3 : i32
    %c0_i32_1 = arith.constant 0 : i32
    %5 = arith.cmpi ne, %4, %c0_i32_1 : i32
    %c0_i32_2 = arith.constant 0 : i32
    %6 = arith.cmpi slt, %4, %c0_i32_2 : i32
    %c0_i32_3 = arith.constant 0 : i32
    %7 = arith.cmpi slt, %3, %c0_i32_3 : i32
    %8 = arith.xori %6, %7 : i1
    %9 = arith.andi %8, %5 : i1
    %10 = arith.addi %4, %3 : i32
    %11 = arith.select %9, %10, %4 : i32
    %c0_i32_4 = arith.constant 0 : i32
    %12 = arith.cmpi eq, %arg0, %c0_i32_4 : i32
    %c0_i32_5 = arith.constant 0 : i32
    %13 = arith.cmpi eq, %arg1, %c0_i32_5 : i32
    %14 = arith.andi %12, %13 : i1
    %15 = arith.extui %14 : i1 to i32
    %c0_i32_6 = arith.constant 0 : i32
    %16 = arith.cmpi ne, %15, %c0_i32_6 : i32
    scf.if %16 {
      %c256_i32 = arith.constant 256 : i32
      %137 = arith.muli %arg1, %c256_i32 : i32
      %138 = tpu.assume_multiple %137, 128 : i32
      %c0_i32_63 = arith.constant 0 : i32
      %c0_i32_64 = arith.constant 0 : i32
      %139 = tpu.memref_slice %arg2[%arg0, %c0_i32_64, %138] : memref<2x4x256xf32, #tpu.memory_space<any>> -> memref<1x4x256xf32, #tpu.memory_space<any>>
      %140 = tpu.memref_squeeze %139 : memref<1x4x256xf32, #tpu.memory_space<any>> -> memref<4x256xf32, #tpu.memory_space<any>>
      %c0_i32_65 = arith.constant 0 : i32
      %c128_i32_66 = arith.constant 128 : i32
      %141 = tpu.memref_slice %arg7[%11, %c0_i32_65, %c128_i32_66] : memref<2x4x401xf32, #tpu.memory_space<vmem>> -> memref<1x4x256xf32, #tpu.memory_space<vmem>>
      %142 = tpu.memref_squeeze %141 : memref<1x4x256xf32, #tpu.memory_space<vmem>> -> memref<4x256xf32, #tpu.memory_space<vmem>>
      %143 = tpu.memref_slice %arg8[%11, %c0_i32_63] : memref<2x3x!tpu.dma_semaphore, #tpu.memory_space<semaphore_mem>> -> memref<1x1x!tpu.dma_semaphore, #tpu.memory_space<semaphore_mem>>
      %144 = tpu.memref_squeeze %143 : memref<1x1x!tpu.dma_semaphore, #tpu.memory_space<semaphore_mem>> -> memref<!tpu.dma_semaphore, #tpu.memory_space<semaphore_mem>>
      tpu.enqueue_dma source(%140 : memref<4x256xf32, #tpu.memory_space<any>>) target(%142 : memref<4x256xf32, #tpu.memory_space<vmem>>) target_semaphore(%144 : memref<!tpu.dma_semaphore, #tpu.memory_space<semaphore_mem>>)
    } else {
    }
    %c0_i32_7 = arith.constant 0 : i32
    %c0_i32_8 = arith.constant 0 : i32
    %c0_i32_9 = arith.constant 0 : i32
    %c0_i32_10 = arith.constant 0 : i32
    %17 = tpu.memref_slice %arg2[%c0_i32_7, %c0_i32_9, %c0_i32_10] : memref<2x4x256xf32, #tpu.memory_space<any>> -> memref<1x4x256xf32, #tpu.memory_space<any>>
    %18 = tpu.memref_squeeze %17 : memref<1x4x256xf32, #tpu.memory_space<any>> -> memref<4x256xf32, #tpu.memory_space<any>>
    %c0_i32_11 = arith.constant 0 : i32
    %c128_i32 = arith.constant 128 : i32
    %19 = tpu.memref_slice %arg7[%11, %c0_i32_11, %c128_i32] : memref<2x4x401xf32, #tpu.memory_space<vmem>> -> memref<1x4x256xf32, #tpu.memory_space<vmem>>
    %20 = tpu.memref_squeeze %19 : memref<1x4x256xf32, #tpu.memory_space<vmem>> -> memref<4x256xf32, #tpu.memory_space<vmem>>
    %21 = tpu.memref_slice %arg8[%11, %c0_i32_8] : memref<2x3x!tpu.dma_semaphore, #tpu.memory_space<semaphore_mem>> -> memref<1x1x!tpu.dma_semaphore, #tpu.memory_space<semaphore_mem>>
    %22 = tpu.memref_squeeze %21 : memref<1x1x!tpu.dma_semaphore, #tpu.memory_space<semaphore_mem>> -> memref<!tpu.dma_semaphore, #tpu.memory_space<semaphore_mem>>
    tpu.wait_dma2 semaphore(%22 : memref<!tpu.dma_semaphore, #tpu.memory_space<semaphore_mem>>) src(%18 : memref<4x256xf32, #tpu.memory_space<any>>) dst(%20 : memref<4x256xf32, #tpu.memory_space<vmem>>)
    %c1_i32_12 = arith.constant 1 : i32
    %23 = arith.addi %arg1, %c1_i32_12 : i32
    %c1_i32_13 = arith.constant 1 : i32
    %24 = arith.cmpi slt, %23, %c1_i32_13 : i32
    %c1_i32_14 = arith.constant 1 : i32
    %25 = arith.addi %arg0, %c1_i32_14 : i32
    %c2_i32_15 = arith.constant 2 : i32
    %26 = arith.cmpi slt, %25, %c2_i32_15 : i32
    %27 = arith.ori %24, %26 : i1
    %c1_i32_16 = arith.constant 1 : i32
    %28 = arith.addi %arg0, %c1_i32_16 : i32
    %29 = arith.select %24, %arg0, %28 : i32
    %c1_i32_17 = arith.constant 1 : i32
    %30 = arith.addi %arg1, %c1_i32_17 : i32
    %c0_i32_18 = arith.constant 0 : i32
    %31 = arith.select %24, %30, %c0_i32_18 : i32
    %32 = arith.extui %27 : i1 to i32
    %c0_i32_19 = arith.constant 0 : i32
    %33 = arith.cmpi ne, %32, %c0_i32_19 : i32
    scf.if %33 {
      %c1_i32_63 = arith.constant 1 : i32
      %137 = arith.subi %c1_i32_63, %11 : i32
      %c256_i32 = arith.constant 256 : i32
      %138 = arith.muli %31, %c256_i32 : i32
      %139 = tpu.assume_multiple %138, 128 : i32
      %c0_i32_64 = arith.constant 0 : i32
      %c0_i32_65 = arith.constant 0 : i32
      %140 = tpu.memref_slice %arg2[%29, %c0_i32_65, %139] : memref<2x4x256xf32, #tpu.memory_space<any>> -> memref<1x4x256xf32, #tpu.memory_space<any>>
      %141 = tpu.memref_squeeze %140 : memref<1x4x256xf32, #tpu.memory_space<any>> -> memref<4x256xf32, #tpu.memory_space<any>>
      %c0_i32_66 = arith.constant 0 : i32
      %c128_i32_67 = arith.constant 128 : i32
      %142 = tpu.memref_slice %arg7[%137, %c0_i32_66, %c128_i32_67] : memref<2x4x401xf32, #tpu.memory_space<vmem>> -> memref<1x4x256xf32, #tpu.memory_space<vmem>>
      %143 = tpu.memref_squeeze %142 : memref<1x4x256xf32, #tpu.memory_space<vmem>> -> memref<4x256xf32, #tpu.memory_space<vmem>>
      %144 = tpu.memref_slice %arg8[%137, %c0_i32_64] : memref<2x3x!tpu.dma_semaphore, #tpu.memory_space<semaphore_mem>> -> memref<1x1x!tpu.dma_semaphore, #tpu.memory_space<semaphore_mem>>
      %145 = tpu.memref_squeeze %144 : memref<1x1x!tpu.dma_semaphore, #tpu.memory_space<semaphore_mem>> -> memref<!tpu.dma_semaphore, #tpu.memory_space<semaphore_mem>>
      tpu.enqueue_dma source(%141 : memref<4x256xf32, #tpu.memory_space<any>>) target(%143 : memref<4x256xf32, #tpu.memory_space<vmem>>) target_semaphore(%145 : memref<!tpu.dma_semaphore, #tpu.memory_space<semaphore_mem>>)
    } else {
    }
    %cst = arith.constant 0.000000e+00 : f32
    %34 = vector.broadcast %cst : f32 to vector<4x16xf32>
    %c0_i32_20 = arith.constant 0 : i32
    %35 = arith.cmpi eq, %arg1, %c0_i32_20 : i32
    %36 = arith.extui %35 : i1 to i32
    %c0_i32_21 = arith.constant 0 : i32
    %37 = arith.cmpi ne, %36, %c0_i32_21 : i32
    scf.if %37 {
      %137 = arith.index_cast %11 : i32 to index
      %c0_63 = arith.constant 0 : index
      %c112_64 = arith.constant 112 : index
      %138 = vector.load %arg7[%137, %c0_63, %c112_64] : memref<2x4x401xf32, #tpu.memory_space<vmem>>, vector<1x4x16xf32>
      %139 = vector.shape_cast %138 : vector<1x4x16xf32> to vector<4x16xf32>
      %140 = vector.shape_cast %34 : vector<4x16xf32> to vector<1x4x16xf32>
      tpu.vector_store %arg7[%137, %c0_63, %c112_64], %140 {strides = array<i32>} : memref<2x4x401xf32, #tpu.memory_space<vmem>>, vector<1x4x16xf32>,
    } else {
    }
    %c0_i32_22 = arith.constant 0 : i32
    %38 = arith.cmpi eq, %arg1, %c0_i32_22 : i32
    %39 = arith.extui %38 : i1 to i32
    %c0_i32_23 = arith.constant 0 : i32
    %40 = arith.cmpi ne, %39, %c0_i32_23 : i32
    scf.if %40 {
      %137 = arith.index_cast %11 : i32 to index
      %c0_63 = arith.constant 0 : index
      %c384 = arith.constant 384 : index
      %138 = vector.load %arg7[%137, %c0_63, %c384] : memref<2x4x401xf32, #tpu.memory_space<vmem>>, vector<1x4x16xf32>
      %139 = vector.shape_cast %138 : vector<1x4x16xf32> to vector<4x16xf32>
      %140 = vector.shape_cast %34 : vector<4x16xf32> to vector<1x4x16xf32>
      tpu.vector_store %arg7[%137, %c0_63, %c384], %140 {strides = array<i32>} : memref<2x4x401xf32, #tpu.memory_space<vmem>>, vector<1x4x16xf32>,
    } else {
    }
    %c0 = arith.constant 0 : index
    %c0_24 = arith.constant 0 : index
    %41 = vector.load %arg5[%c0, %c0_24] : memref<1x256xi32, #tpu.memory_space<vmem>>, vector<1x256xi32>
    %c0_i32_25 = arith.constant 0 : i32
    %42 = vector.broadcast %c0_i32_25 : i32 to vector<1x256xi32>
    %43 = arith.cmpi ne, %41, %42 : vector<1x256xi32>
    %c15_i32 = arith.constant 15 : i32
    %44 = vector.broadcast %c15_i32 : i32 to vector<1x256xi32>
    %45 = arith.cmpi ne, %41, %44 : vector<1x256xi32>
    %cst_26 = arith.constant 0.000000e+00 : f32
    %46 = vector.broadcast %cst_26 : f32 to vector<8x256xf32>
    %c0_27 = arith.constant 0 : index
    %c0_28 = arith.constant 0 : index
    %c0_29 = arith.constant 0 : index
    %47 = vector.load %arg3[%c0_27, %c0_28, %c0_29] : memref<3x8x12xf32, #tpu.memory_space<vmem>>, vector<1x8x12xf32>
    %48 = vector.shape_cast %47 : vector<1x8x12xf32> to vector<8x12xf32>
    %49 = arith.index_cast %11 : i32 to index
    %c0_30 = arith.constant 0 : index
    %c111 = arith.constant 111 : index
    %50 = vector.load %arg7[%49, %c0_30, %c111] : memref<2x4x401xf32, #tpu.memory_space<vmem>>, vector<1x4x256xf32>
    %51 = vector.shape_cast %50 : vector<1x4x256xf32> to vector<4x256xf32>
    %cst_31 = arith.constant 0.000000e+00 : f32
    %52 = vector.broadcast %cst_31 : f32 to vector<4x256xf32>
    %53 = vector.shape_cast %43 : vector<1x256xi1> to vector<1x256xi1>
    %54 = vector.broadcast %53 : vector<1x256xi1> to vector<4x256xi1>
    %55 = arith.select %54, %51, %52 : vector<4x256xi1>, vector<4x256xf32>
    %56 = vector.extract_strided_slice %48 {offsets = [0, 0], sizes = [8, 4], strides = [1, 1]} : vector<8x12xf32> to vector<8x4xf32>
    %cst_32 = arith.constant dense<0.000000e+00> : vector<8x256xf32>
    %57 = tpu.matmul %56, %55, %cst_32 {dimension_numbers = #tpu.dot_dimension_numbers<[1], [0], [0], [1], [0, 0, 1, 1], [], []>} : vector<8x4xf32>, vector<4x256xf32>, vector<8x256xf32> -> vector<8x256xf32>
    %58 = arith.addf %46, %57 : vector<8x256xf32>
    %59 = arith.index_cast %11 : i32 to index
    %c0_33 = arith.constant 0 : index
    %c127 = arith.constant 127 : index
    %60 = vector.load %arg7[%59, %c0_33, %c127] : memref<2x4x401xf32, #tpu.memory_space<vmem>>, vector<1x4x256xf32>
    %61 = vector.shape_cast %60 : vector<1x4x256xf32> to vector<4x256xf32>
    %cst_34 = arith.constant 0.000000e+00 : f32
    %62 = vector.broadcast %cst_34 : f32 to vector<4x256xf32>
    %63 = vector.shape_cast %43 : vector<1x256xi1> to vector<1x256xi1>
    %64 = vector.broadcast %63 : vector<1x256xi1> to vector<4x256xi1>
    %65 = arith.select %64, %61, %62 : vector<4x256xi1>, vector<4x256xf32>
    %66 = vector.extract_strided_slice %48 {offsets = [0, 4], sizes = [8, 4], strides = [1, 1]} : vector<8x12xf32> to vector<8x4xf32>
    %cst_35 = arith.constant dense<0.000000e+00> : vector<8x256xf32>
    %67 = tpu.matmul %66, %65, %cst_35 {dimension_numbers = #tpu.dot_dimension_numbers<[1], [0], [0], [1], [0, 0, 1, 1], [], []>} : vector<8x4xf32>, vector<4x256xf32>, vector<8x256xf32> -> vector<8x256xf32>
    %68 = arith.addf %58, %67 : vector<8x256xf32>
    %69 = arith.index_cast %11 : i32 to index
    %c0_36 = arith.constant 0 : index
    %c143 = arith.constant 143 : index
    %70 = vector.load %arg7[%69, %c0_36, %c143] : memref<2x4x401xf32, #tpu.memory_space<vmem>>, vector<1x4x256xf32>
    %71 = vector.shape_cast %70 : vector<1x4x256xf32> to vector<4x256xf32>
    %cst_37 = arith.constant 0.000000e+00 : f32
    %72 = vector.broadcast %cst_37 : f32 to vector<4x256xf32>
    %73 = vector.shape_cast %43 : vector<1x256xi1> to vector<1x256xi1>
    %74 = vector.broadcast %73 : vector<1x256xi1> to vector<4x256xi1>
    %75 = arith.select %74, %71, %72 : vector<4x256xi1>, vector<4x256xf32>
    %76 = vector.extract_strided_slice %48 {offsets = [0, 8], sizes = [8, 4], strides = [1, 1]} : vector<8x12xf32> to vector<8x4xf32>
    %cst_38 = arith.constant dense<0.000000e+00> : vector<8x256xf32>
    %77 = tpu.matmul %76, %75, %cst_38 {dimension_numbers = #tpu.dot_dimension_numbers<[1], [0], [0], [1], [0, 0, 1, 1], [], []>} : vector<8x4xf32>, vector<4x256xf32>, vector<8x256xf32> -> vector<8x256xf32>
    %78 = arith.addf %68, %77 : vector<8x256xf32>
    %c1 = arith.constant 1 : index
    %c0_39 = arith.constant 0 : index
    %c0_40 = arith.constant 0 : index
    %79 = vector.load %arg3[%c1, %c0_39, %c0_40] : memref<3x8x12xf32, #tpu.memory_space<vmem>>, vector<1x8x12xf32>
    %80 = vector.shape_cast %79 : vector<1x8x12xf32> to vector<8x12xf32>
    %81 = arith.index_cast %11 : i32 to index
    %c0_41 = arith.constant 0 : index
    %c112 = arith.constant 112 : index
    %82 = vector.load %arg7[%81, %c0_41, %c112] : memref<2x4x401xf32, #tpu.memory_space<vmem>>, vector<1x4x256xf32>
    %83 = vector.shape_cast %82 : vector<1x4x256xf32> to vector<4x256xf32>
    %84 = vector.extract_strided_slice %80 {offsets = [0, 0], sizes = [8, 4], strides = [1, 1]} : vector<8x12xf32> to vector<8x4xf32>
    %cst_42 = arith.constant dense<0.000000e+00> : vector<8x256xf32>
    %85 = tpu.matmul %84, %83, %cst_42 {dimension_numbers = #tpu.dot_dimension_numbers<[1], [0], [0], [1], [0, 0, 1, 1], [], []>} : vector<8x4xf32>, vector<4x256xf32>, vector<8x256xf32> -> vector<8x256xf32>
    %86 = arith.addf %78, %85 : vector<8x256xf32>
    %87 = arith.index_cast %11 : i32 to index
    %c0_43 = arith.constant 0 : index
    %c128 = arith.constant 128 : index
    %88 = vector.load %arg7[%87, %c0_43, %c128] : memref<2x4x401xf32, #tpu.memory_space<vmem>>, vector<1x4x256xf32>
    %89 = vector.shape_cast %88 : vector<1x4x256xf32> to vector<4x256xf32>
    %90 = vector.extract_strided_slice %80 {offsets = [0, 4], sizes = [8, 4], strides = [1, 1]} : vector<8x12xf32> to vector<8x4xf32>
    %cst_44 = arith.constant dense<0.000000e+00> : vector<8x256xf32>
    %91 = tpu.matmul %90, %89, %cst_44 {dimension_numbers = #tpu.dot_dimension_numbers<[1], [0], [0], [1], [0, 0, 1, 1], [], []>} : vector<8x4xf32>, vector<4x256xf32>, vector<8x256xf32> -> vector<8x256xf32>
    %92 = arith.addf %86, %91 : vector<8x256xf32>
    %93 = arith.index_cast %11 : i32 to index
    %c0_45 = arith.constant 0 : index
    %c144 = arith.constant 144 : index
    %94 = vector.load %arg7[%93, %c0_45, %c144] : memref<2x4x401xf32, #tpu.memory_space<vmem>>, vector<1x4x256xf32>
    %95 = vector.shape_cast %94 : vector<1x4x256xf32> to vector<4x256xf32>
    %96 = vector.extract_strided_slice %80 {offsets = [0, 8], sizes = [8, 4], strides = [1, 1]} : vector<8x12xf32> to vector<8x4xf32>
    %cst_46 = arith.constant dense<0.000000e+00> : vector<8x256xf32>
    %97 = tpu.matmul %96, %95, %cst_46 {dimension_numbers = #tpu.dot_dimension_numbers<[1], [0], [0], [1], [0, 0, 1, 1], [], []>} : vector<8x4xf32>, vector<4x256xf32>, vector<8x256xf32> -> vector<8x256xf32>
    %98 = arith.addf %92, %97 : vector<8x256xf32>
    %c2 = arith.constant 2 : index
    %c0_47 = arith.constant 0 : index
    %c0_48 = arith.constant 0 : index
    %99 = vector.load %arg3[%c2, %c0_47, %c0_48] : memref<3x8x12xf32, #tpu.memory_space<vmem>>, vector<1x8x12xf32>
    %100 = vector.shape_cast %99 : vector<1x8x12xf32> to vector<8x12xf32>
    %101 = arith.index_cast %11 : i32 to index
    %c0_49 = arith.constant 0 : index
    %c113 = arith.constant 113 : index
    %102 = vector.load %arg7[%101, %c0_49, %c113] : memref<2x4x401xf32, #tpu.memory_space<vmem>>, vector<1x4x256xf32>
    %103 = vector.shape_cast %102 : vector<1x4x256xf32> to vector<4x256xf32>
    %cst_50 = arith.constant 0.000000e+00 : f32
    %104 = vector.broadcast %cst_50 : f32 to vector<4x256xf32>
    %105 = vector.shape_cast %45 : vector<1x256xi1> to vector<1x256xi1>
    %106 = vector.broadcast %105 : vector<1x256xi1> to vector<4x256xi1>
    %107 = arith.select %106, %103, %104 : vector<4x256xi1>, vector<4x256xf32>
    %108 = vector.extract_strided_slice %100 {offsets = [0, 0], sizes = [8, 4], strides = [1, 1]} : vector<8x12xf32> to vector<8x4xf32>
    %cst_51 = arith.constant dense<0.000000e+00> : vector<8x256xf32>
    %109 = tpu.matmul %108, %107, %cst_51 {dimension_numbers = #tpu.dot_dimension_numbers<[1], [0], [0], [1], [0, 0, 1, 1], [], []>} : vector<8x4xf32>, vector<4x256xf32>, vector<8x256xf32> -> vector<8x256xf32>
    %110 = arith.addf %98, %109 : vector<8x256xf32>
    %111 = arith.index_cast %11 : i32 to index
    %c0_52 = arith.constant 0 : index
    %c129 = arith.constant 129 : index
    %112 = vector.load %arg7[%111, %c0_52, %c129] : memref<2x4x401xf32, #tpu.memory_space<vmem>>, vector<1x4x256xf32>
    %113 = vector.shape_cast %112 : vector<1x4x256xf32> to vector<4x256xf32>
    %cst_53 = arith.constant 0.000000e+00 : f32
    %114 = vector.broadcast %cst_53 : f32 to vector<4x256xf32>
    %115 = vector.shape_cast %45 : vector<1x256xi1> to vector<1x256xi1>
    %116 = vector.broadcast %115 : vector<1x256xi1> to vector<4x256xi1>
    %117 = arith.select %116, %113, %114 : vector<4x256xi1>, vector<4x256xf32>
    %118 = vector.extract_strided_slice %100 {offsets = [0, 4], sizes = [8, 4], strides = [1, 1]} : vector<8x12xf32> to vector<8x4xf32>
    %cst_54 = arith.constant dense<0.000000e+00> : vector<8x256xf32>
    %119 = tpu.matmul %118, %117, %cst_54 {dimension_numbers = #tpu.dot_dimension_numbers<[1], [0], [0], [1], [0, 0, 1, 1], [], []>} : vector<8x4xf32>, vector<4x256xf32>, vector<8x256xf32> -> vector<8x256xf32>
    %120 = arith.addf %110, %119 : vector<8x256xf32>
    %121 = arith.index_cast %11 : i32 to index
    %c0_55 = arith.constant 0 : index
    %c145 = arith.constant 145 : index
    %122 = vector.load %arg7[%121, %c0_55, %c145] : memref<2x4x401xf32, #tpu.memory_space<vmem>>, vector<1x4x256xf32>
    %123 = vector.shape_cast %122 : vector<1x4x256xf32> to vector<4x256xf32>
    %cst_56 = arith.constant 0.000000e+00 : f32
    %124 = vector.broadcast %cst_56 : f32 to vector<4x256xf32>
    %125 = vector.shape_cast %45 : vector<1x256xi1> to vector<1x256xi1>
    %126 = vector.broadcast %125 : vector<1x256xi1> to vector<4x256xi1>
    %127 = arith.select %126, %123, %124 : vector<4x256xi1>, vector<4x256xf32>
    %128 = vector.extract_strided_slice %100 {offsets = [0, 8], sizes = [8, 4], strides = [1, 1]} : vector<8x12xf32> to vector<8x4xf32>
    %cst_57 = arith.constant dense<0.000000e+00> : vector<8x256xf32>
    %129 = tpu.matmul %128, %127, %cst_57 {dimension_numbers = #tpu.dot_dimension_numbers<[1], [0], [0], [1], [0, 0, 1, 1], [], []>} : vector<8x4xf32>, vector<4x256xf32>, vector<8x256xf32> -> vector<8x256xf32>
    %130 = arith.addf %120, %129 : vector<8x256xf32>
    %c0_58 = arith.constant 0 : index
    %c0_59 = arith.constant 0 : index
    %131 = vector.load %arg4[%c0_58, %c0_59] : memref<8x1xf32, #tpu.memory_space<vmem>>, vector<8x1xf32>
    %132 = vector.broadcast %131 : vector<8x1xf32> to vector<8x256xf32>
    %133 = arith.addf %130, %132 : vector<8x256xf32>
    %c0_60 = arith.constant 0 : index
    %c0_61 = arith.constant 0 : index
    %c0_62 = arith.constant 0 : index
    %134 = vector.load %arg6[%c0_60, %c0_61, %c0_62] : memref<1x8x256xf32, #tpu.memory_space<vmem>>, vector<1x8x256xf32>
    %135 = vector.shape_cast %134 : vector<1x8x256xf32> to vector<8x256xf32>
    %136 = vector.shape_cast %133 : vector<8x256xf32> to vector<1x8x256xf32>
    tpu.vector_store %arg6[%c0_60, %c0_61, %c0_62], %136 {strides = array<i32>} : memref<1x8x256xf32, #tpu.memory_space<vmem>>, vector<1x8x256xf32>,
    return
  }
  func.func @transform_1(%arg0: i32, %arg1: i32) -> (i32, i32, i32) {
    %c0_i32 = arith.constant 0 : i32
    %c0_i32_0 = arith.constant 0 : i32
    %c0_i32_1 = arith.constant 0 : i32
    %c0_i32_2 = arith.constant 0 : i32
    return %c0_i32, %c0_i32_0, %c0_i32_1 : i32, i32, i32
  }
  func.func @transform_2(%arg0: i32, %arg1: i32) -> (i32, i32) {
    %c0_i32 = arith.constant 0 : i32
    %c0_i32_0 = arith.constant 0 : i32
    %c0_i32_1 = arith.constant 0 : i32
    return %c0_i32, %c0_i32_0 : i32, i32
  }
  func.func @transform_3(%arg0: i32, %arg1: i32) -> (i32, i32) {
    %c0_i32 = arith.constant 0 : i32
    %c0_i32_0 = arith.constant 0 : i32
    %c0_i32_1 = arith.constant 0 : i32
    return %c0_i32, %c0_i32_0 : i32, i32
  }
  func.func @transform_4(%arg0: i32, %arg1: i32) -> (i32, i32, i32) {
    %c0_i32 = arith.constant 0 : i32
    %c0_i32_0 = arith.constant 0 : i32
    return %arg0, %c0_i32, %arg1 : i32, i32, i32
  }
}

</mosaic_0001>

<bundles_post_ra>
// kernel: tpu_custom_call.1
= control target key start
LH: loop header
LB: loop body
LE: loop exit
PB: predicated region body
PF: predicated region fallthrough
CT: control target
= control target key end

     0   :  { %s2069_s0 = inlined_call_operand.hbm [shape: f32[2,4,256], index: 0, kind: input, shape index: {}]   ;;  %s2070_s1 = inlined_call_operand.hbm [shape: f32[3,8,12], index: 1, kind: input, shape index: {}]   ;;  %s2071_s2 = inlined_call_operand.vmem [shape: f32[8,1], index: 2, kind: input, shape index: {}]   ;;  %s2072_s3 = inlined_call_operand.vmem [shape: s32[1,256], index: 3, kind: input, shape index: {}]   ;;  %s2073_s4 = inlined_call_operand.hbm [shape: f32[2,8,256], index: 4, kind: output, shape index: {}]  }
   0x1   :  { %2082 = sst [smem:[#allocation17_spill]] %s2070_s1 }
   0x2   :  { %9 = vsyncpa [#allocation5], 0 }
   0x3   :  { %10 = vsyncpa [#allocation6], 0 }
   0x4   :  { %12 = vsyncpa [#allocation6 + $0x1], 0  ;;  %s1729_s15 = smov 0   ;;  %s1731_s16 = smov 0  }
   0x5   :  { %s1733_s17 = smov 0   ;;  %s1735_s18 = smov 0  }
   0x6   :  { %s1737_s19 = smov 0   ;;  %s1739_s20 = smov 0  }
   0x7 LB: > { %s1341_s21 = sadd.s32 4294967295, %s1685_s20   ;;  %s1342_s22 = sadd.s32 4294967294, %s1685_s20   ;;  %s1685_s20 = sphi %s1739_s20, %s18_s20   ;;  %s1681_s19 = sphi %s1737_s19, %s2102_s19   ;;  %s1677_s18 = sphi %s1735_s18, %s2101_s18   ;;  %s1673_s17 = sphi %s1733_s17, %s2100_s17   ;;  %s1669_s16 = sphi %s1731_s16, %s2099_s16   ;;  %s1665_s15 = sphi %s1729_s15, %s2098_s15  }
   0x8   : > { %s30_s23 = sadd.s32 1, %s1681_s19  ;;  %s102_s24 = sadd.s32 1, %s1673_s17 }
   0x9   : > { %p32_p0 = scmp.ge.s32.totalorder %s30_s23, 2  ;;  %p112_p1 = scmp.ne.s32.totalorder %s1673_s17, %s1669_s16 }
   0xa   : > { %p113_p2 = scmp.eq.s32.totalorder %s1341_s21, 1  ;;  %p118_p3 = scmp.ne.s32.totalorder %s1669_s16, %s1665_s15 }
   0xb   : > { %s2104_s23 = smov (%p32_p0, %s30_s23), 0  ;;  %p119_p5 = scmp.eq.s32.totalorder %s1342_s22, 1 }
   0xc   : > { %p1769_p4 = por %p113_p2, %p112_p1  ;;  %s97_s26 = ssub.s32 %s1681_s19, %s2104_s23 }
   0xd   : > { %p1343_p6 = scmp.ge.s32.totalorder %s1685_s20, 1  ;;  %p100_p7 = scmp.eq.s32.totalorder %s97_s26, 0 }
   0xe   : > { %s2083_s25 = scalar_select %p1769_p4, 1, 0 }
   0xf   : > { %p1776_p8 = por %p119_p5, %p118_p3  ;;  %p126_p9 = scmp.lt.s32.totalorder %s1685_s20, 3 }
  0x10   : > { %s1782_s28 = scalar_select %p100_p7, %s1673_s17, %s102_s24  }
  0x11   : > { %s2084_s27 = scalar_select %p1776_p8, 1, 0 }
  0x12   : > { %p1784_p10 = pnand %p1343_p6, %p126_p9  ;;  %p1788_p11 = scmp.eq.s32.totalorder %s1341_s21, 0 }
  0x13   : > { %s1687_s5 = smov [#allocation4]   ;;  %s2088_s1 = sld [smem:[#allocation17_spill]] }
  0x14   : > { %s2085_s29 = scalar_select %p1784_p10, 1, 0 }
  0x15   : > { %s2086_s30 = scalar_select %p1788_p11, 1, 0 }
  0x16   : > { %p1440_p12 = pneg %p1784_p10  ;;  %s138_s6 = sshll.u32 %s1687_s5, 4  ;;  %s139_s6 = int_to_ptr.vmem [resolvable:$true] %s138_s6 }
  0x18   : > { %p1796_p13 = pnand %p1788_p11, %p1440_p12 }
  0x19   : > { %s1517_s10 = scalar_lea.hbm %s2088_s1, 384 }
  0x1a   : > { %p1518_p0 = scmp.ne.s32.totalorder %s2088_s1, %s1517_s10  ;;  %p1519_p1 = pneg %p1796_p13 }
  0x1b   : > { %p1524_p5 = scmp.lt.u32.totalorder %s1517_s10, %s2088_s1 }
  0x1c   : > { %p1520_p2 = pnand %p1519_p1, %p1518_p0 }
  0x1e   : > { %p1521_p3 = pneg %p1520_p2 }
  0x20   : > { %p1526_p6 = pnand %p1524_p5, %p1521_p3 }
  0x22   : > { %1529 = shalt.err (!%p1526_p6)
}
  0x23   : > { %s1530_s21 = scalar_lea.vmem %s139_s6, 384  ;;  %p1538_p8 = scmp.lt.s32.totalorder %s139_s6, %s139_s6 }
  0x24   : > { %p1531_p7 = scmp.ne.s32.totalorder %s139_s6, %s1530_s21  ;;  %p1539_p4 = scmp.lt.s32.totalorder %s1530_s21, %s1530_s21 }
  0x26   : > { %p1533_p9 = pnand %p1531_p7, %p1519_p1  ;;  %p1540_p11 = por %p1539_p4, %p1538_p8 }
  0x28   : > { %p1534_p12 = pneg %p1533_p9 }
  0x2a   : > { %p1541_p10 = pnand %p1540_p11, %p1534_p12 }
  0x2c   : > { %1544 = shalt.err (!%p1541_p10)
}
  0x2d   : > { %s1688_s22 = smov 128   ;;  %s1689_s24 = smov 8  }
  0x2e   : > { %1443 = dma.hbm_to_vmem [thread:$0]  (!%p1796_p13), %s2088_s1, 384, %s139_s6, [#allocation5], %s1688_s22, %s1688_s22, %s1689_s24  }
  0x2f   : > { %p2089_p0 = scmp.ne.s32.totalorder %s2085_s29, 0 }
  0x30   : > { %p2090_p2 = scmp.ne.s32.totalorder (!%p2089_p0), %s2086_s30, 0 }
  0x31   : > { %160 = sbr.rel (%p2089_p0) target bundleno = 525 (0x20d), region = 32 }
  0x38   : > { %1654 = dma.done.wait (%p2090_p2), [#allocation5], 384  }
  0x39   : > { %1656 = vsyncadd (%p2090_p2), [#allocation5], 4294966912  ;;  %s2078_s7 = sand.u32 1, %s1669_s16   ;;  %p181_p4 = scmp.lt.s32.totalorder %s1677_s18, 0 }
  0x3a   : > { %s1826_s6 = sshll.u32 %s2078_s7, 4  ;;  %s182_s29 = ssub.s32 0, %s1677_s18 }
  0x3b   : > { %s1348_s8 = smin.u32 %s1677_s18, %s182_s29  ;;  %s2079_s11 = sshll.u32 %s1677_s18, 7 }
  0x3c   : > { %s184_s9 = sand.u32 1, %s1348_s8   ;;  %p193_p10 = scmp.eq.s32.totalorder %s1677_s18, 0 }
  0x3d   : > { %s185_s10 = ssub.s32 0, %s184_s9  ;;  %s1841_s22 = scalar_lea.hbm %s2069_s0, %s2079_s11 }
  0x3e   : > { %s2106_s10 = smov (!%p181_p4, %s185_s10), %s184_s9  ;;  %s1545_s8 = scalar_lea.hbm %s1841_s22, 128 }
  0x3f   : > { %p1350_p8 = scmp.lt.s32.totalorder %s2106_s10, 0  ;;  %s191_s30 = sadd.s32 2, %s2106_s10 }
  0x40   : > { %p1546_p11 = scmp.ne.s32.totalorder %s1841_s22, %s1545_s8  ;;  %s2081_s14 = scalar_lea.hbm %s2069_s0, 256 }
  0x41   : > { %s2108_s30 = smov (!%p1350_p8, %s191_s30), %s2106_s10  ;;  %p1550_p3 = scmp.lt.u32.totalorder %s1841_s22, %s2069_s0 }
  0x42   : > { %s1405_s12 = sshll.u32 %s2108_s30, 4  ;;  %s210_s13 = smul.u32 3, %s2108_s30 }
  0x43   : > { %s1843_s24 = scalar_lea.vmem [#allocation2], %s1405_s12  ;;  %p1547_p13 = pnand %p1546_p11, %p193_p10 }
  0x44   : > { %s1279_s26 = scalar_lea.vmem %s1843_s24, 4 [#allocation2]  ;;  %s211_s29 = scalar_lea.sflag [#allocation3], %s210_s13 }
  0x45   : > { %s219_s5 = sshll.u32 %s1279_s26, 4  ;;  %p1548_p1 = pneg %p1547_p13  ;;  %s220_s5 = int_to_ptr.vmem [resolvable:$true] %s219_s5 }
  0x46   : > { %p1551_p5 = scmp.lt.u32.totalorder %s2081_s14, %s1545_s8  ;;  %p1553_p7 = scmp.lt.u32.totalorder %s1545_s8, %s1841_s22 }
  0x48   : > { %p1552_p6 = por %p1551_p5, %p1550_p3 }
  0x4a   : > { %p1554_p9 = por %p1553_p7, %p1552_p6 }
  0x4c   : > { %p1555_p12 = pnand %p1554_p9, %p1548_p1 }
  0x4e   : > { %1558 = shalt.err (!%p1555_p12)  }
  0x4f   : > { %s1559_s13 = scalar_lea.vmem %s220_s5, 128  ;;  %s1690_s26 = smov [#allocation2]  }
  0x50   : > { %p1560_p0 = scmp.ne.s32.totalorder %s220_s5, %s1559_s13  ;;  %s1563_s9 = sshll.u32 %s1690_s26, 4  ;;  %s1864_s9 = int_to_ptr.vmem [resolvable:$false] %s1563_s9 }
  0x51   : > { %s2080_s7 = scalar_lea.vmem %s1864_s9, 512  ;;  %p1566_p8 = scmp.lt.s32.totalorder %s220_s5, %s1864_s9 }
  0x52   : > { %p1561_p2 = pnand %p1560_p0, %p193_p10  ;;  %p1567_p11 = scmp.lt.s32.totalorder %s2080_s7, %s1559_s13 }
  0x54   : > { %p1562_p4 = pneg %p1561_p2  ;;  %p1568_p13 = por %p1567_p11, %p1566_p8 }
  0x56   : > { %p1569_p1 = pnand %p1568_p13, %p1562_p4 }
  0x58   : > { %1572 = shalt.err (!%p1569_p1)  }
  0x59   : > { %1435 = dma.hbm_to_vmem [thread:$0]  (%p193_p10), %s1841_s22, 128, %s220_s5, %s211_s29 }
  0x5a   : > { %s1874_s11 = scalar_lea.vmem [#allocation7], %s1826_s6 }
  0x5b   : > { %1657 = dma.done.wait %s211_s29, 128 }
  0x5c   : > { %1658 = vsyncadd %s211_s29, 4294967168  ;;  %s231_s8 = sadd.s32 1, %s1677_s18  ;;  %s239_s10 = ssub.s32 1, %s2108_s30  ;;  %v1691_v0 = vmov 0.0   ;;  %vm270_vm0 = vcmask 1044352   ;;  %vm272_vm1 = vcmask 125952  }
  0x5d   : > { %p1878_p3 = scmp.lt.s32.totalorder %s231_s8, 2  ;;  %758 = vmatprep.mubr.f32.mxu0 %v1691_v0  ;;  %400 = vmatprep.mubr.f32.mxu1 %v1691_v0  ;;  %s2092_s22 = sshll.u32 %s1677_s18, 7 }
  0x5e   : > { %s1414_s6 = sadd.s32 128, %s2092_s22  ;;  %s1409_s5 = sshll.u32 %s239_s10, 4 }
  0x5f   : > { %s1889_s13 = scalar_lea.hbm %s2069_s0, %s1414_s6  ;;  %s1290_s30 = scalar_lea.vmem [#allocation2], %s1409_s5 }
  0x60   : > { %s1291_s26 = scalar_lea.vmem %s1290_s30, 4 [#allocation2]  ;;  %s251_s8 = smul.u32 3, %s239_s10 }
  0x61   : > { %s260_s7 = sshll.u32 %s1291_s26, 4  ;;  %s1573_s1 = scalar_lea.hbm %s1889_s13, 128  ;;  %s261_s7 = int_to_ptr.vmem [resolvable:$true] %s260_s7 }
  0x62   : > { %s252_s14 = scalar_lea.sflag [#allocation3], %s251_s8  ;;  %p1574_p10 = scmp.ne.s32.totalorder %s1889_s13, %s1573_s1 }
  0x63   : > { %p1578_p7 = scmp.lt.u32.totalorder %s1889_s13, %s2069_s0  ;;  %s2093_s5 = scalar_lea.hbm %s2069_s0, 256 }
  0x64   : > { %p1575_p5 = pnand %p1574_p10, %p1878_p3  ;;  %p1579_p9 = scmp.lt.u32.totalorder %s2093_s5, %s1573_s1 }
  0x65   : > { %p1581_p0 = scmp.lt.u32.totalorder %s1573_s1, %s1889_s13 }
  0x66   : > { %p1576_p6 = pneg %p1575_p5  ;;  %p1580_p12 = por %p1579_p9, %p1578_p7 }
  0x68   : > { %p1582_p2 = por %p1581_p0, %p1580_p12 }
  0x6a   : > { %p1583_p4 = pnand %p1582_p2, %p1576_p6 }
  0x6c   : > { %1586 = shalt.err (!%p1583_p4)  }
  0x6d   : > { %s1587_s10 = scalar_lea.vmem %s261_s7, 128  ;;  %p1594_p1 = scmp.lt.s32.totalorder %s261_s7, %s1864_s9 }
  0x6e   : > { %p1588_p8 = scmp.ne.s32.totalorder %s261_s7, %s1587_s10  ;;  %s2094_s30 = scalar_lea.vmem %s1864_s9, 512 }
  0x6f   : > { %p1595_p10 = scmp.lt.s32.totalorder %s2094_s30, %s1587_s10 }
  0x70   : > { %p1589_p11 = pnand %p1588_p8, %p1878_p3 }
  0x71   : > { %p1596_p5 = por %p1595_p10, %p1594_p1 }
  0x72   : > { %p1590_p13 = pneg %p1589_p11 }
  0x74   : > { %p1597_p7 = pnand %p1596_p5, %p1590_p13 }
  0x76   : > { %1600 = shalt.err (!%p1597_p7)  }
  0x77   : > { %1437 = dma.hbm_to_vmem [thread:$0]  (%p1878_p3), %s1889_s13, 128, %s261_s7, %s252_s14  ;;  %v1912_v1 = vld [vmem:[#allocation4 + $0x8] sm:$0xff]  ;;  %v1914_v2 = vld [vmem:[#allocation4] sm:$0xff]  ;;  %v1693_v3 = vmov 0   ;;  %vm329_vm2 = vcmask 1043456   ;;  %v1938_v13 = vld [vmem:[#allocation4 + $0x10] sm:$0xff]  ;;  %v284_v17 = vlaneseq }
  0x78   : > { %s1692_s1 = smov 124   ;;  %271 = vst.msk [vmem:[%s1843_s24] sm:$0xf] %vm270_vm0, %v1691_v0  ;;  %1515 = vset.pattern.permute.xlu0 %v1693_v3  ;;  %s1694_s14 = smov 120   ;;  %v282_v4 = vld [vmem:[%s1843_s24 + $0x8] sm:$0xf] }
  0x79   : > { %684 = vrot.lane.b32.xlu0 %v1912_v1, %s1692_s1  ;;  %324 = vrot.lane.b32.xlu1 %v1914_v2, %s1692_s1  ;;  %273 = vst.msk [vmem:[%s1843_s24 + $0xc] sm:$0xf] %vm272_vm1, %v1691_v0  ;;  %v767_v5 = vld [vmem:[%s1843_s24 + $0x4] sm:$0xff]  ;;  %s1695_s9 = smov 1   ;;  %s1696_s7 = smov 112   ;;  %vm326_vm3 = vcmask 31744  }
  0x7a   : > { %v773_v6 = vcombine.high %v767_v5, %v767_v5  ;;  %s1697_s21 = smov 17   ;;  %v865_v10 = vld [vmem:[%s1843_s24 + $0x8] sm:$0xf]  ;;  %s1698_s13 = smov 15   ;;  %v1177_v16 = vld [vmem:[%s2071_s2] sm:$0xff]  ;;  %v285_v21 = vshrl.u32 %v284_v17, 7 }
  0x7b   : > { %s1699_s26 = smov 113   ;;  %s1700_s8 = smov 127   ;;  %v590_v15 = vld [vmem:[%s1843_s24 + $0x8] sm:$0xf]  ;;  %v274_v20 = vld [vmem:[%s2072_s3] sm:$0x3] }
  0x7c   : > { %1377 = vmatprep.subr.msk.mxu0 %vm329_vm2, %v773_v6  ;;  %s1701_s22 = smov 111   ;;  %s1702_s6 = smov 16   ;;  %vm275_vm4 = vcmp.ne.s32.totalorder %v274_v20, 0  ;;  %v290_v24 = vsub.s32 1, %v285_v21  ;;  %v286_v25 = vsub.s32 0, %v285_v21  ;;  %vm276_vm5 = vcmp.ne.s32.totalorder %v274_v20, 15 }
  0x7d   : > { %769 = vrot.lane.b32.xlu0 %v1912_v1, %s1694_s14  ;;  %314 = vrot.lane.b32.xlu1 %v282_v4, %s1695_s9  ;;  %v283_v27 = vsel %vm275_vm4, 1, %v1693_v3  ;;  %vm780_vm6 = vcmask 916480   ;;  %vm316_vm7 = vcmask 7168   ;;  %v866_v35 = vsel %vm276_vm5, 1, %v1693_v3  ;;  %s1412_s10 = sshll.u32 %s1677_s18, 8  ;;  %s1204_s30 = sshll.u32 %s1874_s11, 4  ;;  %s2020_s30 = int_to_ptr.vmem [resolvable:$true] %s1204_s30 }
  0x7e   : > { %1378 = vmatpush1.msk.msra.mxu0 %vm329_vm2, %v767_v5  ;;  %v291_v29 = vrot.slane %v283_v27, %v290_v24  ;;  %v1957_v30 = vrot.slane %v283_v27, %v286_v25  ;;  %vm303_vm10 = vcmask 138240   ;;  %v874_v42 = vrot.slane %v866_v35, %v290_v24  ;;  %p2096_p6 = scmp.ne.s32.totalorder %s2083_s25, 0  ;;  %s1703_s18 = smov [#allocation7]  }
  0x7f   : > { %v281_v7 = vld [vmem:[%s1843_s24] sm:$0xff]  ;;  %vm886_vm11 = vcmask 121856   ;;  %v870_v47 = vrot.slane %v866_v35, %v286_v25  ;;  %vm497_vm14 = vcmask 924672   ;;  %vm986_vm15 = vcmask 1039360  }
  0x80   : > { %v768_v8 = vld [vmem:[%s1843_s24 + $0xc] sm:$0xf]  ;;  %v296_v9 = vcombine.high %v281_v7, %v281_v7  ;;  %vm293_vm8 = vcmp.eq.s32.totalorder %v291_v29, 1  ;;  %vm292_vm9 = vcmp.eq.s32.totalorder %v1957_v30, 1  ;;  %vm876_vm12 = vcmp.eq.s32.totalorder %v874_v42, 1 }
  0x81   : > { %774 = vrot.lane.b32.xlu0 %v767_v5, %s1696_s7  ;;  %310 = vrot.lane.b32.xlu1 %v281_v7, %s1695_s9  ;;  %v487_v11 = vld [vmem:[%s1843_s24 + $0xc] sm:$0xf]  ;;  %vm875_vm13 = vcmp.eq.s32.totalorder %v870_v47, 1  ;;  %vm1087_vm0 = vcmask 908288   ;;  %vm600_vm1 = vcmask 130048  }
  0x82   : > { %v976_v12 = vld [vmem:[%s1843_s24 + $0xc] sm:$0xf] }
  0x83   : > { %v1077_v14 = vld [vmem:[%s1843_s24 + $0xc] sm:$0xf] }
  0x85   : > { %776 = vrot.lane.b32.xlu0 %v773_v6, %s1696_s7  ;;  %778 = vrot.lane.b32.xlu1 %v768_v8, %s1696_s7  ;;  %s2095_s7 = sand.u32 1, %s1669_s16  }
  0x89   : > { %312 = vrot.lane.b32.xlu0 %v296_v9, %s1695_s9  ;;  %299 = vrot.lane.b32.xlu1 %v296_v9, %s1697_s21  ;;  %s2018_s9 = scalar_lea.hbm %s2073_s4, %s1412_s10 }
  0x8d   : > { %301 = vrot.lane.b32.xlu0 %v282_v4, %s1697_s21  ;;  %882 = vrot.lane.b32.xlu1 %v296_v9, %s1698_s13 }
  0x91   : > { %884 = vrot.lane.b32.xlu0 %v865_v10, %s1698_s13  ;;  %297 = vrot.lane.b32.xlu1 %v281_v7, %s1697_s21  ;;  %s1188_s21 = scalar_lea.sflag [#allocation6], %s2095_s7 }
  0x95   : > { %880 = vrot.lane.b32.xlu0 %v281_v7, %s1698_s13  ;;  %493 = vrot.lane.b32.xlu1 %v773_v6, %s1699_s26  ;;  %s1601_s13 = scalar_lea.vmem %s2020_s30, 256 }
  0x96   : > { %p1602_p3 = scmp.ne.s32.totalorder %s2020_s30, %s1601_s13 }
  0x98   : > { %p1603_p9 = pnand %p1602_p3, %p2096_p6 }
  0x99   : > { %495 = vrot.lane.b32.xlu0 %v487_v11, %s1699_s26  ;;  %982 = vrot.lane.b32.xlu1 %v773_v6, %s1700_s8 }
  0x9a   : > { %p1604_p12 = pneg %p1603_p9 }
  0x9d   : > { %984 = vrot.lane.b32.xlu0 %v976_v12, %s1700_s8  ;;  %491 = vrot.lane.b32.xlu1 %v767_v5, %s1699_s26  ;;  %s1605_s26 = sshll.u32 %s1703_s18, 4  ;;  %s1606_s26 = int_to_ptr.vmem [resolvable:$false] %s1605_s26 }
  0x9e   : > { %p1608_p0 = scmp.lt.s32.totalorder %s2020_s30, %s1606_s26 }
  0xa1   : > { %980 = vrot.lane.b32.xlu0 %v767_v5, %s1700_s8  ;;  %504 = vrot.lane.b32.xlu1 %v1914_v2, %s1694_s14  ;;  %s1607_s8 = scalar_lea.vmem %s1606_s26, 512 }
  0xa2   : > { %p1609_p2 = scmp.lt.s32.totalorder %s1607_s8, %s1601_s13 }
  0xa4   : > { %p1610_p4 = por %p1609_p2, %p1608_p0 }
  0xa5   : > { %993 = vrot.lane.b32.xlu0 %v1938_v13, %s1692_s1  ;;  %1083 = vrot.lane.b32.xlu1 %v773_v6, %s1701_s22 }
  0xa6   : > { %p1611_p8 = pnand %p1610_p4, %p1604_p12 }
  0xa9   : > { %1085 = vrot.lane.b32.xlu0 %v1077_v14, %s1701_s22  ;;  %596 = vrot.lane.b32.xlu1 %v296_v9, %s1702_s6 }
  0xad   : > { %598 = vrot.lane.b32.xlu0 %v590_v15, %s1702_s6  ;;  %1081 = vrot.lane.b32.xlu1 %v767_v5, %s1701_s22 }
  0xb1   : > { %594 = vrot.lane.b32.xlu0 %v281_v7, %s1702_s6  ;;  %1094 = vrot.lane.b32.xlu1 %v1938_v13, %s1694_s14 }
  0xb5   : > { %1180 = vperm.xlu0 %1515, %v1177_v16  }
  0xeb   : > { %v685_v18 = vpop.permute.xlu0 %684  ;;  %v325_v19 = vpop.permute.xlu1 %324 }
  0xec   : > { %1379 = vmatmul.mubr.msk.f32.vlgmr.msra.gmra.mrb[0].mxu0 %vm326_vm3, %v685_v18 }
  0xed   : > { %853 = vmatprep.mubr.f32.mxu0 %v1691_v0 }
  0xef   : > { %v770_v22 = vpop.permute.xlu0 %769  ;;  %v315_v23 = vpop.permute.xlu1 %314 }
  0xf3   : > { %v775_v26 = vpop.permute.xlu0 %774  ;;  %v311_v28 = vpop.permute.xlu1 %310 }
  0xf7   : > { %v777_v31 = vpop.permute.xlu0 %776  ;;  %v779_v32 = vpop.permute.xlu1 %778 }
  0xf8   : > { %v782_v33 = vsel %vm780_vm6, %v777_v31, %v779_v32  ;;  %v781_v36 = vsel %vm780_vm6, %v775_v26, %v777_v31 }
  0xf9   : > { %1380 = vmatprep.subr.msk.mxu0 %vm329_vm2, %v782_v33 }
  0xfa   : > { %1381 = vmatpush1.msk.msra.mxu0 %vm329_vm2, %v781_v36 }
  0xfb   : > { %v313_v34 = vpop.permute.xlu0 %312  ;;  %1382 = vmatmul.mubr.msk.f32.vlgmr.msra.gmra.mrb[0].mxu0 %vm326_vm3, %v770_v22  ;;  %v300_v41 = vpop.permute.xlu1 %299 }
  0xfc   : > { %v317_v37 = vsel %vm316_vm7, %v311_v28, %v313_v34  ;;  %v318_v38 = vsel %vm316_vm7, %v313_v34, %v315_v23  ;;  %966 = vmatprep.mubr.f32.mxu0 %v1691_v0 }
  0xfd   : > { %v322_v39 = vsel %vm293_vm8, %v318_v38, 0.0  ;;  %v321_v40 = vsel %vm292_vm9, %v317_v37, 0.0 }
  0xfe   : > { %1365 = vmatprep.subr.msk.mxu1 %vm329_vm2, %v322_v39 }
  0xff   : > { %1366 = vmatpush1.msk.msra.mxu1 %vm329_vm2, %v321_v40  ;;  %v302_v43 = vpop.permute.xlu0 %301  ;;  %v883_v46 = vpop.permute.xlu1 %882 }
 0x100   : > { %v305_v44 = vsel %vm303_vm10, %v300_v41, %v302_v43  ;;  %1367 = vmatmul.mubr.msk.f32.vlgmr.msra.gmra.mrb[0].mxu1 %vm326_vm3, %v325_v19 }
 0x101   : > { %v309_v45 = vsel %vm293_vm8, %v305_v44, 0.0  ;;  %479 = vmatprep.mubr.f32.mxu1 %v1691_v0 }
 0x102   : > { %1368 = vmatprep.subr.msk.mxu1 %vm329_vm2, %v309_v45 }
 0x103   : > { %v885_v48 = vpop.permute.xlu0 %884  ;;  %v298_v51 = vpop.permute.xlu1 %297 }
 0x104   : > { %v888_v49 = vsel %vm886_vm11, %v883_v46, %v885_v48  ;;  %v304_v52 = vsel %vm303_vm10, %v298_v51, %v300_v41 }
 0x105   : > { %v892_v50 = vsel %vm876_vm12, %v888_v49, 0.0  ;;  %v308_v54 = vsel %vm292_vm9, %v304_v52, 0.0 }
 0x106   : > { %1383 = vmatprep.subr.msk.mxu0 %vm329_vm2, %v892_v50  ;;  %1369 = vmatpush1.msk.msra.mxu1 %vm329_vm2, %v308_v54 }
 0x107   : > { %v881_v53 = vpop.permute.xlu0 %880  ;;  %v494_v57 = vpop.permute.xlu1 %493 }
 0x108   : > { %v887_v55 = vsel %vm886_vm11, %v881_v53, %v883_v46  ;;  %1370 = vmatmul.mubr.msk.f32.vlgmr.msra.gmra.mrb[0].mxu1 %vm326_vm3, %v1914_v2 }
 0x109   : > { %v891_v56 = vsel %vm875_vm13, %v887_v55, 0.0  ;;  %578 = vmatprep.mubr.f32.mxu1 %v1691_v0 }
 0x10a   : > { %1384 = vmatpush1.msk.msra.mxu0 %vm329_vm2, %v891_v56 }
 0x10b   : > { %v496_v58 = vpop.permute.xlu0 %495  ;;  %1385 = vmatmul.mubr.msk.f32.vlgmr.msra.gmra.mrb[0].mxu0 %vm326_vm3, %v1938_v13  ;;  %v983_v61 = vpop.permute.xlu1 %982 }
 0x10c   : > { %v499_v59 = vsel %vm497_vm14, %v494_v57, %v496_v58  ;;  %1067 = vmatprep.mubr.f32.mxu0 %v1691_v0 }
 0x10d   : > { %v503_v60 = vsel %vm293_vm8, %v499_v59, 0.0 }
 0x10e   : > { %1371 = vmatprep.subr.msk.mxu1 %vm329_vm2, %v503_v60 }
 0x10f   : > { %v985_v62 = vpop.permute.xlu0 %984  ;;  %v492_v3 = vpop.permute.xlu1 %491 }
 0x110   : > { %v988_v63 = vsel %vm986_vm15, %v983_v61, %v985_v62  ;;  %v498_v4 = vsel %vm497_vm14, %v492_v3, %v494_v57 }
 0x111   : > { %v992_v2 = vsel %vm876_vm12, %v988_v63, 0.0  ;;  %v502_v6 = vsel %vm292_vm9, %v498_v4, 0.0 }
 0x112   : > { %1386 = vmatprep.subr.msk.mxu0 %vm329_vm2, %v992_v2  ;;  %1372 = vmatpush1.msk.msra.mxu1 %vm329_vm2, %v502_v6 }
 0x113   : > { %v981_v5 = vpop.permute.xlu0 %980  ;;  %v505_v9 = vpop.permute.xlu1 %504 }
 0x114   : > { %v987_v7 = vsel %vm986_vm15, %v981_v5, %v983_v61  ;;  %1373 = vmatmul.mubr.msk.f32.vlgmr.msra.gmra.mrb[0].mxu1 %vm326_vm3, %v505_v9 }
 0x115   : > { %v991_v8 = vsel %vm875_vm13, %v987_v7, 0.0  ;;  %674 = vmatprep.mubr.f32.mxu1 %v1691_v0 }
 0x116   : > { %1387 = vmatpush1.msk.msra.mxu0 %vm329_vm2, %v991_v8 }
 0x117   : > { %v994_v10 = vpop.permute.xlu0 %993  ;;  %v1084_v11 = vpop.permute.xlu1 %1083 }
 0x118   : > { %1388 = vmatmul.mubr.msk.f32.vlgmr.msra.gmra.mrb[0].mxu0 %vm326_vm3, %v994_v10 }
 0x119   : > { %1168 = vmatprep.mubr.f32.mxu0 %v1691_v0 }
 0x11b   : > { %v1086_v12 = vpop.permute.xlu0 %1085  ;;  %v597_v15 = vpop.permute.xlu1 %596 }
 0x11c   : > { %v1089_v13 = vsel %vm1087_vm0, %v1084_v11, %v1086_v12 }
 0x11d   : > { %v1093_v14 = vsel %vm876_vm12, %v1089_v13, 0.0 }
 0x11e   : > { %1389 = vmatprep.subr.msk.mxu0 %vm329_vm2, %v1093_v14 }
 0x11f   : > { %v599_v16 = vpop.permute.xlu0 %598  ;;  %v1082_v18 = vpop.permute.xlu1 %1081 }
 0x120   : > { %v602_v17 = vsel %vm600_vm1, %v597_v15, %v599_v16  ;;  %v1088_v19 = vsel %vm1087_vm0, %v1082_v18, %v1084_v11 }
 0x121   : > { %1374 = vmatprep.subr.msk.mxu1 %vm329_vm2, %v602_v17  ;;  %v1092_v0 = vsel %vm875_vm13, %v1088_v19, 0.0 }
 0x122   : > { %1390 = vmatpush1.msk.msra.mxu0 %vm329_vm2, %v1092_v0 }
 0x123   : > { %v595_v20 = vpop.permute.xlu0 %594  ;;  %v1095_v22 = vpop.permute.xlu1 %1094 }
 0x124   : > { %v601_v21 = vsel %vm600_vm1, %v595_v20, %v597_v15  ;;  %1391 = vmatmul.mubr.msk.f32.vlgmr.msra.gmra.mrb[0].mxu0 %vm326_vm3, %v1095_v22 }
 0x125   : > { %1375 = vmatpush1.msk.msra.mxu1 %vm329_vm2, %v601_v21 }
 0x126   : > { %1376 = vmatmul.mubr.msk.f32.vlgmr.msra.gmra.mrb[0].mxu1 %vm326_vm3, %v1912_v1 }
 0x134   : > { %v1181_v24 = vpop.permute.xlu0 %1180 }
 0x1f7   : > { %v1170_v25 = vpop.f32.mrb[0].mxu0 }
 0x1f8   : > { %v1172_v28 = vpop.f32.mrb[1].mxu0 }
 0x1f9   : > { %v676_v23 = vpop.f32.mrb[0].mxu1 }
 0x1fa   : > { %v678_v26 = vpop.f32.mrb[1].mxu1  ;;  %v1415_v27 = vadd.f32 %v1170_v25, %v676_v23 }
 0x1fb   : > { %v1416_v29 = vadd.f32 %v1172_v28, %v678_v26 }
 0x1fc   : > { %v1183_v30 = vadd.f32 %v1415_v27, %v1181_v24 }
 0x1fd   : > { %v1184_v31 = vadd.f32 %v1416_v29, %v1181_v24 }
 0x1fe   : > { %1185 = vst [vmem:[%s1874_s11] sm:$0xff] %v1183_v30 }
 0x1ff   : > { %1186 = vst [vmem:[%s1874_s11 + $0x8] sm:$0xff] %v1184_v31 }
 0x200   : > { %1614 = shalt.err (!%p1611_p8)
}
 0x201   : > { %s1615_s11 = scalar_lea.hbm %s2018_s9, 256  ;;  %s1619_s12 = scalar_lea.hbm %s2073_s4, 512 }
 0x202   : > { %p1616_p11 = scmp.ne.s32.totalorder %s2018_s9, %s1615_s11  ;;  %p1620_p10 = scmp.lt.u32.totalorder %s2018_s9, %s2073_s4 }
 0x203   : > { %p1621_p5 = scmp.lt.u32.totalorder %s1619_s12, %s1615_s11  ;;  %p1623_p3 = scmp.lt.u32.totalorder %s1615_s11, %s2018_s9 }
 0x204   : > { %p1617_p13 = pnand %p1616_p11, %p2096_p6 }
 0x205   : > { %p1622_p7 = por %p1621_p5, %p1620_p10 }
 0x206   : > { %p1618_p1 = pneg %p1617_p13 }
 0x207   : > { %p1624_p9 = por %p1623_p3, %p1622_p7 }
 0x209   : > { %p1625_p12 = pnand %p1624_p9, %p1618_p1 }
 0x20b   : > { %1628 = shalt.err (!%p1625_p12)
}
 0x20c   : > { %1438 = dma.vmem_to_hbm [thread:$0]  (%p2096_p6), %s2020_s30, 256, %s2018_s9, %s1188_s21  }
 0x20d PF: > { %p1451_p0 = scmp.ge.s32.totalorder %s1685_s20, 2  ;;  %s1216_s5 = sand.u32 1, %s1665_s15  }
 0x20e   : > { %p2097_p2 = scmp.ne.s32.totalorder %s2084_s27, 0  ;;  %s1217_s10 = scalar_lea.sflag [#allocation6], %s1216_s5 }
 0x210   : > { %p1445_p4 = pnand %p1451_p0, %p2097_p2 }
 0x212   : > { %1660 = dma.done.wait (!%p1445_p4), %s1217_s10, 256  }
 0x213   : > { %1662 = vsyncadd (!%p1445_p4), %s1217_s10, 4294967040  ;;  %s18_s20 = sadd.s32 1, %s1685_s20   ;;  %s2098_s15 = smov %s1669_s16 }
 0x214   : > { %p15_p8 = scmp.ge.s32.totalorder %s18_s20, 4   ;;  %s2099_s16 = smov %s1673_s17 }
 0x215   : > { %s2100_s17 = smov %s1782_s28  ;;  %s2101_s18 = smov %s1681_s19 }
 0x216   : > { %s2102_s19 = smov %s2104_s23  ;;  %17 = sbr.rel (!%p15_p8) target bundleno = 7 (0x7), region = 105 }
 0x21d   :  { %1222 = vsyncpa [#allocation5], 1 }
 0x21e   :  { %1224 = vsyncpa [#allocation5 + $0x1], 1 }
 0x21f   :  { %1225 = vsyncpa [#allocation6], 1 }
 0x220   :  { %1227 = vsyncpa [#allocation6 + $0x1], 1 }
 0x221   :  { %1228 = vsyncmov [#allocation3] }
 0x224   :  { %s1229_s25 = vpop.sfrf %1228 }
 0x225   :  { %p1397_p6 = scmp.ne.s32.totalorder %s1229_s25, 0 }
 0x227   :  { %1233 = shalt.err (%p1397_p6)  }
 0x228   :  { %1235 = vsyncmov [#allocation3 + $0x1] }
 0x22b   :  { %s1236_s27 = vpop.sfrf %1235 }
 0x22c   :  { %p1398_p11 = scmp.ne.s32.totalorder %s1236_s27, 0 }
 0x22e   :  { %1240 = shalt.err (%p1398_p11)  }
 0x22f   :  { %1242 = vsyncmov [#allocation3 + $0x2] }
 0x232   :  { %s1243_s28 = vpop.sfrf %1242 }
 0x233   :  { %p1399_p13 = scmp.ne.s32.totalorder %s1243_s28, 0 }
 0x235   :  { %1247 = shalt.err (%p1399_p13)  }
 0x236   :  { %1249 = vsyncmov [#allocation3 + $0x3] }
 0x239   :  { %s1250_s23 = vpop.sfrf %1249 }
 0x23a   :  { %p1400_p1 = scmp.ne.s32.totalorder %s1250_s23, 0 }
 0x23c   :  { %1254 = shalt.err (%p1400_p1)  }
 0x23d   :  { %1256 = vsyncmov [#allocation3 + $0x4] }
 0x240   :  { %s1257_s0 = vpop.sfrf %1256 }
 0x241   :  { %p1401_p10 = scmp.ne.s32.totalorder %s1257_s0, 0 }
 0x243   :  { %1261 = shalt.err (%p1401_p10)  }
 0x244   :  { %1263 = vsyncmov [#allocation3 + $0x5] }
 0x247   :  { %s1264_s2 = vpop.sfrf %1263 }
 0x248   :  { %p1402_p5 = scmp.ne.s32.totalorder %s1264_s2, 0 }
 0x24a   :  { %1268 = shalt.err (%p1402_p5)  }

</bundles_post_ra>
